<compile_context>
chip_gen: v7x
topology: tpu7x:2x2x1
jax: 0.10.0
libtpu: 0.0.40
codegen_flags: <defaults>
</compile_context>

<pallas_src>
import functools
import math

import jax
import jax.numpy as jnp
from jax.experimental import pallas as pl
from jax.experimental.pallas import tpu as pltpu

LANE = 128
_V7X_VMEM_BUDGET = 60 * 1024 * 1024   # headroom under v7x's 64 MiB per TC


def _round_up(d, m=LANE):
    return ((d + m - 1) // m) * m


def _pad2d(x, rows, cols):
    r, c = x.shape
    if r == rows and c == cols:
        return x
    return jnp.pad(x, ((0, rows - r), (0, cols - c)))


# ----------------------------- Pallas kernel -------------------------------

def _make_gcn_decoder_kernel(mxu_dtype):
    """Fused decoder kernel.

    mxu_dtype: dtype fed to the MXU.  float32 matches the torch fp32 reference;
    bfloat16 gives ~3-4x MXU throughput / 2x footprint at large N (accumulation
    stays f32 via preferred_element_type) at ~1e-2 relative tolerance.
    """

    def kernel(z_ref, w4_ref, w5_ref, w6_ref, adj_ref, z_hat_ref, z_hat_adj_ref):
        adj = adj_ref[...].astype(mxu_dtype)

        def gnn(x, w_ref):
            # support = x @ W ; out = adj @ support ; relu (active=True everywhere)
            support = jnp.dot(x.astype(mxu_dtype), w_ref[...].astype(mxu_dtype),
                              preferred_element_type=jnp.float32)
            out = jnp.dot(adj, support.astype(mxu_dtype),
                          preferred_element_type=jnp.float32)
            return jnp.maximum(out, 0.0)        # relu in f32 on the accumulator

        h = gnn(z_ref[...], w4_ref)             # gnn_4
        h = gnn(h, w5_ref)                      # gnn_5
        z_hat = gnn(h, w6_ref)                  # gnn_6
        z_hat_ref[...] = z_hat.astype(z_hat_ref.dtype)

        # z_hat @ z_hat.T without materialising a transpose: contract the shared
        # last dim of both operands on the MXU.  Any residual layout shuffle
        # rides the otherwise-idle XLU slot at this size.
        zg = z_hat.astype(mxu_dtype)
        gram = jax.lax.dot_general(
            zg, zg,
            dimension_numbers=(((1,), (1,)), ((), ())),
            preferred_element_type=jnp.float32)
        # No masking over the padded region: VPU/EUP are idle relative to
        # MXU/DMA, and padded rows/cols are sliced off in the wrapper.
        z_hat_adj_ref[...] = jax.nn.sigmoid(gram).astype(z_hat_adj_ref.dtype)

    return kernel


# ----------------------------- wrapper --------------------------------------

def gcn_decoder_pallas(z, w4p, w5p, w6p, adjp, *, dout, mxu_dtype=jnp.float32):
    """Fused decoder on pre-padded weights / adjacency.

    z:            (n, d0)  unpadded latents -- the ONLY per-call pad.
    w4p/w5p/w6p:  lane-dense (128-multiple) padded weights from gcn_decoder_init.
    adjp:         lane-dense padded adjacency from prepare_adj (pad once, reuse).
    Returns (z_hat (n, dout), sigmoid(z_hat @ z_hat.T) (n, n)).
    """
    n, d0 = z.shape
    np_ = adjp.shape[0]
    d0p, d1p = w4p.shape
    d2p = w5p.shape[1]
    doutp = w6p.shape[1]
    assert adjp.shape == (np_, np_)
    assert w5p.shape[0] == d1p and w6p.shape[0] == d2p
    assert n <= np_ and d0 <= d0p and dout <= doutp

    # Single per-call pad: zero rows/cols are mathematically inert for the
    # matmuls and relu(0)=0, so the padded region stays zero through the stack.
    zp = _pad2d(z, np_, d0p)

    # Resident VMEM footprint (inputs + outputs + live intermediates), fp32.
    resident_bytes = 4 * (np_ * d0p                        # z
                          + d0p * d1p + d1p * d2p + d2p * doutp   # weights
                          + np_ * np_                      # adj
                          + np_ * d1p + np_ * d2p          # h1, h2
                          + 2 * np_ * doutp                # z_hat + output copy
                          + np_ * np_)                     # gram output
    vmem_budget = 2 * resident_bytes                       # I/O window copies etc.
    if vmem_budget > _V7X_VMEM_BUDGET:
        # TODO(synk): row-tiled fallback for large N -- grid=(np_//TM,), adj and
        # gram output blocked (TM, np_), dimension_semantics=("parallel",) so the
        # two v7x TensorCores split the row axis, bf16 MXU inputs.
        raise NotImplementedError(
            "all-resident GCN decoder exceeds the v7x VMEM budget; "
            "a row-tiled variant is required at this N")

    flops = 2 * np_ * (d0p * d1p + np_ * d1p               # layer 4
                       + d1p * d2p + np_ * d2p             # layer 5
                       + d2p * doutp + np_ * doutp         # layer 6
                       + np_ * doutp)                      # gram
    bytes_accessed = 4 * (zp.size + w4p.size + w5p.size + w6p.size + adjp.size
                          + np_ * doutp + np_ * np_)

    vmem_spec = pl.BlockSpec(memory_space=pltpu.MemorySpace.VMEM)

    z_hat_p, z_hat_adj_p = pl.pallas_call(
        _make_gcn_decoder_kernel(mxu_dtype),
        out_shape=(jax.ShapeDtypeStruct((np_, doutp), jnp.float32),
                   jax.ShapeDtypeStruct((np_, np_), jnp.float32)),
        in_specs=[vmem_spec] * 5,
        out_specs=(vmem_spec, vmem_spec),
        compiler_params=pltpu.CompilerParams(
            # Default scoped VMEM is 16 MiB (v5e) / 32 MiB (v6e, v7x); size the
            # limit to the actual resident buffers so the fused design keeps
            # working as N grows, long before physical VMEM is exhausted.
            vmem_limit_bytes=max(vmem_budget, 16 * 1024 * 1024)),
        cost_estimate=pl.CostEstimate(
            flops=flops,
            transcendentals=np_ * np_,                     # sigmoid per gram entry
            bytes_accessed=bytes_accessed),
    )(zp, w4p, w5p, w6p, adjp)

    # Slice the zero padding off (padded gram entries are sigmoid(0)=0.5 but lie
    # entirely outside the [:n, :n] window).
    return z_hat_p[:n, :dout], z_hat_adj_p[:n, :n]


# ----------------------------- params / forward -----------------------------

def xavier_uniform(key, shape):
    fan_in, fan_out = shape
    limit = math.sqrt(6.0 / (fan_in + fan_out))
    return jax.random.uniform(key, shape, jnp.float32, -limit, limit)


def gcn_decoder_init(key, gae_n_dec_1, gae_n_dec_2, gae_n_dec_3, n_input):
    """Xavier-init weights, zero-padded ONCE to lane-dense (128-multiple) shapes."""
    k4, k5, k6 = jax.random.split(key, 3)
    d0, d1, d2, d3 = gae_n_dec_1, gae_n_dec_2, gae_n_dec_3, n_input
    d0p, d1p, d2p, d3p = (_round_up(d) for d in (d0, d1, d2, d3))
    w4 = xavier_uniform(k4, (d0, d1))
    w5 = xavier_uniform(k5, (d1, d2))
    w6 = xavier_uniform(k6, (d2, d3))
    return {
        "w4": _pad2d(w4, d0p, d1p),
        "w5": _pad2d(w5, d1p, d2p),
        "w6": _pad2d(w6, d2p, d3p),
    }


def prepare_adj(adj):
    """Pad the (dense) adjacency once; cache and reuse across forward calls."""
    n = adj.shape[0]
    np_ = _round_up(n)
    return _pad2d(adj, np_, np_)


@functools.partial(jax.jit, static_argnames=("dout",))
def gcn_decoder_forward(params, z, adj_padded, dout):
    return gcn_decoder_pallas(z, params["w4"], params["w5"], params["w6"],
                              adj_padded, dout=dout)


# ----------------------------- main ------------------------------------------

if __name__ == "__main__":
    # Small shapes consistent with the module:
    #   N nodes = 16, gae_n_dec_1=8, gae_n_dec_2=16, gae_n_dec_3=32, n_input=64
    N = 16
    gae_n_dec_1, gae_n_dec_2, gae_n_dec_3, n_input = 8, 16, 32, 64

    key = jax.random.PRNGKey(0)
    kp, kz, ka = jax.random.split(key, 3)

    params = gcn_decoder_init(kp, gae_n_dec_1, gae_n_dec_2, gae_n_dec_3, n_input)

    z = jax.random.normal(kz, (N, gae_n_dec_1), jnp.float32)
    # Simple symmetric row-normalized adjacency (dense stand-in for spmm input).
    a = (jax.random.uniform(ka, (N, N)) > 0.5).astype(jnp.float32)
    a = a + a.T + jnp.eye(N, dtype=jnp.float32)
    a = jnp.minimum(a, 1.0)
    adj = a / jnp.sum(a, axis=1, keepdims=True)

    adj_padded = prepare_adj(adj)   # pad once, reuse every forward call

    z_hat, z_hat_adj = gcn_decoder_forward(params, z, adj_padded, n_input)
    jax.block_until_ready((z_hat, z_hat_adj))

    # Reference check in plain JAX (same math).  Padded weight regions are zero,
    # so the sliced views equal the logical xavier-initialised weights.
    w4 = params["w4"][:gae_n_dec_1, :gae_n_dec_2]
    w5 = params["w5"][:gae_n_dec_2, :gae_n_dec_3]
    w6 = params["w6"][:gae_n_dec_3, :n_input]

    h = jnp.maximum(adj @ (z @ w4), 0.0)
    h = jnp.maximum(adj @ (h @ w5), 0.0)
    zh_ref = jnp.maximum(adj @ (h @ w6), 0.0)
    za_ref = jax.nn.sigmoid(zh_ref @ zh_ref.T)

    assert z_hat.shape == (N, n_input)
    assert z_hat_adj.shape == (N, N)
    assert jnp.allclose(z_hat, zh_ref, atol=1e-5, rtol=1e-5)
    assert jnp.allclose(z_hat_adj, za_ref, atol=1e-5, rtol=1e-5)

    print("KERNEL_OK")
</pallas_src>

<mosaic_0001>
module attributes {stable_mosaic.version = 11 : i64} {
  func.func @kernel(%arg0: memref<128x128xf32, #tpu.memory_space<vmem>>, %arg1: memref<128x128xf32, #tpu.memory_space<vmem>>, %arg2: memref<128x128xf32, #tpu.memory_space<vmem>>, %arg3: memref<128x128xf32, #tpu.memory_space<vmem>>, %arg4: memref<128x128xf32, #tpu.memory_space<vmem>>, %arg5: memref<128x128xf32, #tpu.memory_space<vmem>>, %arg6: memref<128x128xf32, #tpu.memory_space<vmem>>) attributes {dimension_semantics = [], scalar_prefetch = 0 : i64, scratch_operands = 0 : i64, tpu.core_type = #tpu.core_type<tc>} {
    %c0 = arith.constant 0 : index
    %c0_0 = arith.constant 0 : index
    %0 = vector.load %arg4[%c0, %c0_0] : memref<128x128xf32, #tpu.memory_space<vmem>>, vector<128x128xf32>
    %c0_1 = arith.constant 0 : index
    %c0_2 = arith.constant 0 : index
    %1 = vector.load %arg0[%c0_1, %c0_2] : memref<128x128xf32, #tpu.memory_space<vmem>>, vector<128x128xf32>
    %c0_3 = arith.constant 0 : index
    %c0_4 = arith.constant 0 : index
    %2 = vector.load %arg1[%c0_3, %c0_4] : memref<128x128xf32, #tpu.memory_space<vmem>>, vector<128x128xf32>
    %cst = arith.constant dense<0.000000e+00> : vector<128x128xf32>
    %3 = tpu.matmul %1, %2, %cst {dimension_numbers = #tpu.dot_dimension_numbers<[1], [0], [0], [1], [0, 0, 1, 1], [], []>} : vector<128x128xf32>, vector<128x128xf32>, vector<128x128xf32> -> vector<128x128xf32>
    %cst_5 = arith.constant dense<0.000000e+00> : vector<128x128xf32>
    %4 = tpu.matmul %0, %3, %cst_5 {dimension_numbers = #tpu.dot_dimension_numbers<[1], [0], [0], [1], [0, 0, 1, 1], [], []>} : vector<128x128xf32>, vector<128x128xf32>, vector<128x128xf32> -> vector<128x128xf32>
    %cst_6 = arith.constant 0.000000e+00 : f32
    %5 = vector.broadcast %cst_6 : f32 to vector<128x128xf32>
    %6 = arith.maximumf %4, %5 : vector<128x128xf32>
    %c0_7 = arith.constant 0 : index
    %c0_8 = arith.constant 0 : index
    %7 = vector.load %arg2[%c0_7, %c0_8] : memref<128x128xf32, #tpu.memory_space<vmem>>, vector<128x128xf32>
    %cst_9 = arith.constant dense<0.000000e+00> : vector<128x128xf32>
    %8 = tpu.matmul %6, %7, %cst_9 {dimension_numbers = #tpu.dot_dimension_numbers<[1], [0], [0], [1], [0, 0, 1, 1], [], []>} : vector<128x128xf32>, vector<128x128xf32>, vector<128x128xf32> -> vector<128x128xf32>
    %cst_10 = arith.constant dense<0.000000e+00> : vector<128x128xf32>
    %9 = tpu.matmul %0, %8, %cst_10 {dimension_numbers = #tpu.dot_dimension_numbers<[1], [0], [0], [1], [0, 0, 1, 1], [], []>} : vector<128x128xf32>, vector<128x128xf32>, vector<128x128xf32> -> vector<128x128xf32>
    %cst_11 = arith.constant 0.000000e+00 : f32
    %10 = vector.broadcast %cst_11 : f32 to vector<128x128xf32>
    %11 = arith.maximumf %9, %10 : vector<128x128xf32>
    %c0_12 = arith.constant 0 : index
    %c0_13 = arith.constant 0 : index
    %12 = vector.load %arg3[%c0_12, %c0_13] : memref<128x128xf32, #tpu.memory_space<vmem>>, vector<128x128xf32>
    %cst_14 = arith.constant dense<0.000000e+00> : vector<128x128xf32>
    %13 = tpu.matmul %11, %12, %cst_14 {dimension_numbers = #tpu.dot_dimension_numbers<[1], [0], [0], [1], [0, 0, 1, 1], [], []>} : vector<128x128xf32>, vector<128x128xf32>, vector<128x128xf32> -> vector<128x128xf32>
    %cst_15 = arith.constant dense<0.000000e+00> : vector<128x128xf32>
    %14 = tpu.matmul %0, %13, %cst_15 {dimension_numbers = #tpu.dot_dimension_numbers<[1], [0], [0], [1], [0, 0, 1, 1], [], []>} : vector<128x128xf32>, vector<128x128xf32>, vector<128x128xf32> -> vector<128x128xf32>
    %cst_16 = arith.constant 0.000000e+00 : f32
    %15 = vector.broadcast %cst_16 : f32 to vector<128x128xf32>
    %16 = arith.maximumf %14, %15 : vector<128x128xf32>
    %c0_17 = arith.constant 0 : index
    %c0_18 = arith.constant 0 : index
    %17 = vector.load %arg5[%c0_17, %c0_18] : memref<128x128xf32, #tpu.memory_space<vmem>>, vector<128x128xf32>
    tpu.vector_store %arg5[%c0_17, %c0_18], %16 {strides = array<i32>} : memref<128x128xf32, #tpu.memory_space<vmem>>, vector<128x128xf32>,
    %cst_19 = arith.constant dense<0.000000e+00> : vector<128x128xf32>
    %18 = tpu.matmul %16, %16, %cst_19 {dimension_numbers = #tpu.dot_dimension_numbers<[1], [1], [0], [0], [0, 0, 1, 0], [], []>} : vector<128x128xf32>, vector<128x128xf32>, vector<128x128xf32> -> vector<128x128xf32>
    %19 = arith.negf %18 : vector<128x128xf32>
    %20 = math.exp %19 : vector<128x128xf32>
    %cst_20 = arith.constant 1.000000e+00 : f32
    %21 = vector.broadcast %cst_20 : f32 to vector<128x128xf32>
    %22 = arith.addf %21, %20 : vector<128x128xf32>
    %23 = arith.divf %21, %22 : vector<128x128xf32>
    %c0_21 = arith.constant 0 : index
    %c0_22 = arith.constant 0 : index
    %24 = vector.load %arg6[%c0_21, %c0_22] : memref<128x128xf32, #tpu.memory_space<vmem>>, vector<128x128xf32>
    tpu.vector_store %arg6[%c0_21, %c0_22], %23 {strides = array<i32>} : memref<128x128xf32, #tpu.memory_space<vmem>>, vector<128x128xf32>,
    return
  }
}

</mosaic_0001>

<bundles_post_ra>
// kernel: gcn_decoder_forward.1
= control target key start
LH: loop header
LB: loop body
LE: loop exit
PB: predicated region body
PF: predicated region fallthrough
CT: control target
= control target key end

     0   :  { %12 = vsyncpa [#allocation3], 0  ;;  %s2713_s0 = inlined_call_operand.vmem [shape: f32[128,128], index: 0, kind: input, shape index: {}]   ;;  %s2714_s1 = inlined_call_operand.vmem [shape: f32[128,128], index: 1, kind: input, shape index: {}]   ;;  %s2715_s2 = inlined_call_operand.hbm [shape: f32[128,128], index: 2, kind: input, shape index: {}]   ;;  %s2716_s3 = inlined_call_operand.hbm [shape: f32[128,128], index: 3, kind: input, shape index: {}]   ;;  %s2717_s4 = inlined_call_operand.hbm [shape: f32[128,128], index: 4, kind: input, shape index: {}]   ;;  %s2718_s5 = inlined_call_operand.vmem [shape: f32[128,128], index: 5, kind: output, shape index: {0}]   ;;  %s2719_s6 = inlined_call_operand.vmem [shape: f32[128,128], index: 6, kind: output, shape index: {1}]  }
   0x1   :  { %13 = vsyncpa [#allocation5], 0  ;;  %s2339_s21 = smov [#allocation4]   ;;  %s2340_s23 = smov [#allocation2]  }
   0x2   :  { %s35_s22 = sshll.u32 %s2339_s21, 4  ;;  %s23_s24 = sshll.u32 %s2340_s23, 4  ;;  %s36_s22 = int_to_ptr.vmem [resolvable:$true] %s35_s22  ;;  %s2379_s24 = int_to_ptr.vmem [resolvable:$true] %s23_s24 }
   0x3   :  { %s2269_s27 = scalar_lea.hbm %s2716_s3, 2048 }
   0x4   :  { %p2270_p0 = scmp.ne.s32.totalorder %s2716_s3, %s2269_s27  ;;  %p2273_p1 = scmp.lt.u32.totalorder %s2269_s27, %s2716_s3 }
   0x6   :  { %p2275_p2 = pnand %p2273_p1, %p2270_p0 }
   0x8   :  { %2278 = shalt.err (!%p2275_p2)
}
   0x9   :  { %s2279_s8 = scalar_lea.vmem %s36_s22, 2048  ;;  %p2284_p4 = scmp.lt.s32.totalorder %s36_s22, %s36_s22 }
   0xa   :  { %p2280_p3 = scmp.ne.s32.totalorder %s36_s22, %s2279_s8  ;;  %p2285_p5 = scmp.lt.s32.totalorder %s2279_s8, %s2279_s8 }
   0xc   :  { %p2286_p6 = por %p2285_p5, %p2284_p4 }
   0xe   :  { %p2287_p7 = pnand %p2286_p6, %p2280_p3 }
  0x10   :  { %2290 = shalt.err (!%p2287_p7)
}
  0x11   :  { %s2341_s9 = smov 128   ;;  %s2342_s10 = smov 8  }
  0x12   :  { %41 = dma.hbm_to_vmem [thread:$0]  %s2716_s3, 2048, %s36_s22, [#allocation5], %s2341_s9, %s2341_s9, %s2342_s10  }
  0x13   :  { %s2291_s15 = scalar_lea.hbm %s2715_s2, 2048 }
  0x14   :  { %p2292_p8 = scmp.ne.s32.totalorder %s2715_s2, %s2291_s15  ;;  %p2295_p9 = scmp.lt.u32.totalorder %s2291_s15, %s2715_s2 }
  0x16   :  { %p2297_p10 = pnand %p2295_p9, %p2292_p8 }
  0x18   :  { %2300 = shalt.err (!%p2297_p10)
}
  0x19   :  { %s2301_s20 = scalar_lea.vmem %s2379_s24, 2048  ;;  %p2306_p12 = scmp.lt.s32.totalorder %s2379_s24, %s2379_s24 }
  0x1a   :  { %p2302_p11 = scmp.ne.s32.totalorder %s2379_s24, %s2301_s20  ;;  %p2307_p13 = scmp.lt.s32.totalorder %s2301_s20, %s2301_s20 }
  0x1c   :  { %p2308_p0 = por %p2307_p13, %p2306_p12 }
  0x1e   :  { %p2309_p1 = pnand %p2308_p0, %p2302_p11 }
  0x20   :  { %2312 = shalt.err (!%p2309_p1)
}
  0x21   :  { %29 = dma.hbm_to_vmem [thread:$0]  %s2715_s2, 2048, %s2379_s24, [#allocation3], %s2341_s9, %s2341_s9, %s2342_s10  }
  0x22   :  { %s2343_s22 = smov [#allocation6]   ;;  %s2313_s27 = scalar_lea.hbm %s2717_s4, 2048 }
  0x23   :  { %s47_s23 = sshll.u32 %s2343_s22, 4  ;;  %p2314_p2 = scmp.ne.s32.totalorder %s2717_s4, %s2313_s27  ;;  %s48_s23 = int_to_ptr.vmem [resolvable:$true] %s47_s23 }
  0x24   :  { %p2317_p3 = scmp.lt.u32.totalorder %s2313_s27, %s2717_s4 }
  0x26   :  { %p2319_p4 = pnand %p2317_p3, %p2314_p2 }
  0x28   :  { %2322 = shalt.err (!%p2319_p4)
}
  0x29   :  { %s2323_s8 = scalar_lea.vmem %s48_s23, 2048  ;;  %p2328_p6 = scmp.lt.s32.totalorder %s48_s23, %s48_s23 }
  0x2a   :  { %p2324_p5 = scmp.ne.s32.totalorder %s48_s23, %s2323_s8  ;;  %p2329_p7 = scmp.lt.s32.totalorder %s2323_s8, %s2323_s8 }
  0x2c   :  { %p2330_p8 = por %p2329_p7, %p2328_p6 }
  0x2e   :  { %p2331_p9 = pnand %p2330_p8, %p2324_p5 }
  0x30   :  { %2334 = shalt.err (!%p2331_p9)
}
  0x31   :  { %53 = dma.hbm_to_vmem [thread:$0]  %s2717_s4, 2048, %s48_s23, [#allocation5], %s2341_s9, %s2341_s9, %s2342_s10  }
  0x32   :  { %2335 = dma.done.wait [#allocation3], 2048  }
  0x33   :  { %2336 = vsyncadd [#allocation3], 4294965248 }
  0x34   :  { %2337 = dma.done.wait [#allocation5], 4096  }
  0x35   :  { %2338 = vsyncadd [#allocation5], 4294963200  ;;  %v95_v0 = vld [vmem:[%s2714_s1] sm:$0xff]  ;;  %v96_v1 = vld [vmem:[%s2714_s1 + $0x8] sm:$0xff] }
  0x36   :  { %v97_v2 = vld [vmem:[%s2714_s1 + $0x10] sm:$0xff]  ;;  %v1976_v3 = vpack.c.bf16 %v96_v1, %v95_v0  ;;  %v98_v4 = vld [vmem:[%s2714_s1 + $0x18] sm:$0xff]  ;;  %v99_v6 = vld [vmem:[%s2714_s1 + $0x20] sm:$0xff] }
  0x37   :  { %v1980_v5 = vpack.c.bf16 %v98_v4, %v97_v2  ;;  %v100_v7 = vld [vmem:[%s2714_s1 + $0x28] sm:$0xff]  ;;  %v79_v9 = vld [vmem:[%s2713_s0] sm:$0xff]  ;;  %v101_v10 = vld [vmem:[%s2714_s1 + $0x30] sm:$0xff] }
  0x38   :  { %1977 = vmatprep.subr.bf16.mxu1 %v1976_v3  ;;  %v1984_v8 = vpack.c.bf16 %v100_v7, %v99_v6  ;;  %v102_v11 = vld [vmem:[%s2714_s1 + $0x38] sm:$0xff]  ;;  %1616 = vmatprep.mubr.f32.mxu1 %v79_v9  ;;  %v103_v13 = vld [vmem:[%s2714_s1 + $0x40] sm:$0xff]  ;;  %v104_v14 = vld [vmem:[%s2714_s1 + $0x48] sm:$0xff] }
  0x39   :  { %1979 = vmatpush3.bf16.msra.mxu1 %v1976_v3  ;;  %v1988_v12 = vpack.c.bf16 %v102_v11, %v101_v10  ;;  %v1992_v15 = vpack.c.bf16 %v104_v14, %v103_v13  ;;  %v105_v16 = vld [vmem:[%s2714_s1 + $0x50] sm:$0xff]  ;;  %v106_v17 = vld [vmem:[%s2714_s1 + $0x58] sm:$0xff]  ;;  %v107_v19 = vld [vmem:[%s2714_s1 + $0x60] sm:$0xff] }
  0x3a   :  { %1981 = vmatprep.subr.bf16.mxu1 %v1980_v5  ;;  %v1996_v18 = vpack.c.bf16 %v106_v17, %v105_v16  ;;  %v108_v20 = vld [vmem:[%s2714_s1 + $0x68] sm:$0xff]  ;;  %v109_v22 = vld [vmem:[%s2714_s1 + $0x70] sm:$0xff]  ;;  %v110_v23 = vld [vmem:[%s2714_s1 + $0x78] sm:$0xff] }
  0x3b   :  { %v2000_v21 = vpack.c.bf16 %v108_v20, %v107_v19  ;;  %v2004_v24 = vpack.c.bf16 %v110_v23, %v109_v22  ;;  %v80_v25 = vld [vmem:[%s2713_s0 + $0x8] sm:$0xff]  ;;  %v81_v26 = vld [vmem:[%s2713_s0 + $0x10] sm:$0xff]  ;;  %v82_v27 = vld [vmem:[%s2713_s0 + $0x18] sm:$0xff] }
  0x3c   :  { %v83_v28 = vld [vmem:[%s2713_s0 + $0x20] sm:$0xff]  ;;  %v84_v29 = vld [vmem:[%s2713_s0 + $0x28] sm:$0xff]  ;;  %v85_v30 = vld [vmem:[%s2713_s0 + $0x30] sm:$0xff] }
  0x3d   :  { %1983 = vmatpush3.bf16.msra.mxu1 %v1980_v5  ;;  %v86_v31 = vld [vmem:[%s2713_s0 + $0x38] sm:$0xff]  ;;  %v87_v32 = vld [vmem:[%s2713_s0 + $0x40] sm:$0xff]  ;;  %v88_v33 = vld [vmem:[%s2713_s0 + $0x48] sm:$0xff] }
  0x3e   :  { %1985 = vmatprep.subr.bf16.mxu1 %v1984_v8  ;;  %v89_v34 = vld [vmem:[%s2713_s0 + $0x50] sm:$0xff]  ;;  %v90_v35 = vld [vmem:[%s2713_s0 + $0x58] sm:$0xff]  ;;  %v91_v36 = vld [vmem:[%s2713_s0 + $0x60] sm:$0xff] }
  0x3f   :  { %v92_v37 = vld [vmem:[%s2713_s0 + $0x68] sm:$0xff]  ;;  %v93_v38 = vld [vmem:[%s2713_s0 + $0x70] sm:$0xff]  ;;  %v94_v39 = vld [vmem:[%s2713_s0 + $0x78] sm:$0xff] }
  0x40   :  { %v2527_v40 = vld [vmem:[#allocation6] sm:$0xff]  ;;  %v418_v42 = vld [vmem:[#allocation2 + $0x8] sm:$0xff]  ;;  %v419_v43 = vld [vmem:[#allocation2 + $0x10] sm:$0xff] }
  0x41   :  { %1987 = vmatpush3.bf16.msra.mxu1 %v1984_v8  ;;  %v417_v41 = vld [vmem:[#allocation2] sm:$0xff]  ;;  %v420_v45 = vld [vmem:[#allocation2 + $0x18] sm:$0xff]  ;;  %v422_v48 = vld [vmem:[#allocation2 + $0x28] sm:$0xff] }
  0x42   :  { %1989 = vmatprep.subr.bf16.mxu1 %v1988_v12  ;;  %v2040_v44 = vpack.c.bf16 %v418_v42, %v417_v41  ;;  %v2044_v46 = vpack.c.bf16 %v420_v45, %v419_v43  ;;  %v421_v47 = vld [vmem:[#allocation2 + $0x20] sm:$0xff]  ;;  %v423_v50 = vld [vmem:[#allocation2 + $0x30] sm:$0xff]  ;;  %v424_v51 = vld [vmem:[#allocation2 + $0x38] sm:$0xff] }
  0x43   :  { %v2048_v49 = vpack.c.bf16 %v422_v48, %v421_v47  ;;  %v2052_v52 = vpack.c.bf16 %v424_v51, %v423_v50  ;;  %v425_v53 = vld [vmem:[#allocation2 + $0x40] sm:$0xff]  ;;  %v426_v54 = vld [vmem:[#allocation2 + $0x48] sm:$0xff]  ;;  %v427_v56 = vld [vmem:[#allocation2 + $0x50] sm:$0xff] }
  0x44   :  { %2041 = vmatprep.subr.bf16.mxu0 %v2040_v44  ;;  %v2056_v55 = vpack.c.bf16 %v426_v54, %v425_v53  ;;  %v428_v57 = vld [vmem:[#allocation2 + $0x58] sm:$0xff]  ;;  %v429_v59 = vld [vmem:[#allocation2 + $0x60] sm:$0xff]  ;;  %v430_v60 = vld [vmem:[#allocation2 + $0x68] sm:$0xff] }
  0x45   :  { %1991 = vmatpush3.bf16.msra.mxu1 %v1988_v12  ;;  %2043 = vmatpush3.bf16.msra.mxu0 %v2040_v44  ;;  %v2060_v58 = vpack.c.bf16 %v428_v57, %v427_v56  ;;  %v2064_v61 = vpack.c.bf16 %v430_v60, %v429_v59  ;;  %v2530_v22 = vld [vmem:[#allocation6 + $0x8] sm:$0xff]  ;;  %v2532_v23 = vld [vmem:[#allocation6 + $0x10] sm:$0xff] }
  0x46   :  { %1993 = vmatprep.subr.bf16.mxu1 %v1992_v15  ;;  %2045 = vmatprep.subr.bf16.mxu0 %v2044_v46 }
  0x49   :  { %1995 = vmatpush3.bf16.msra.mxu1 %v1992_v15  ;;  %2047 = vmatpush3.bf16.msra.mxu0 %v2044_v46 }
  0x4a   :  { %1997 = vmatprep.subr.bf16.mxu1 %v1996_v18  ;;  %2049 = vmatprep.subr.bf16.mxu0 %v2048_v49 }
  0x4d   :  { %1999 = vmatpush3.bf16.msra.mxu1 %v1996_v18  ;;  %2051 = vmatpush3.bf16.msra.mxu0 %v2048_v49 }
  0x4e   :  { %2001 = vmatprep.subr.bf16.mxu1 %v2000_v21  ;;  %2053 = vmatprep.subr.bf16.mxu0 %v2052_v52 }
  0x51   :  { %2003 = vmatpush3.bf16.msra.mxu1 %v2000_v21  ;;  %2055 = vmatpush3.bf16.msra.mxu0 %v2052_v52 }
  0x52   :  { %2005 = vmatprep.subr.bf16.mxu1 %v2004_v24  ;;  %2057 = vmatprep.subr.bf16.mxu0 %v2056_v55 }
  0x55   :  { %2007 = vmatpush3.bf16.msra.mxu1 %v2004_v24  ;;  %2059 = vmatpush3.bf16.msra.mxu0 %v2056_v55  ;;  %v2536_v24 = vld [vmem:[#allocation6 + $0x18] sm:$0xff] }
  0x56   :  { %2061 = vmatprep.subr.bf16.mxu0 %v2060_v58 }
  0x58   :  { %1617 = vmatmul.mubr.f32.vlgmr.msra.gmra.mrb[0].mxu1 %v80_v25  ;;  %v2538_v25 = vld [vmem:[#allocation6 + $0x20] sm:$0xff] }
  0x59   :  { %1619 = vmatprep.mubr.f32.mxu1 %v81_v26  ;;  %2063 = vmatpush3.bf16.msra.mxu0 %v2060_v58  ;;  %v2542_v26 = vld [vmem:[#allocation6 + $0x28] sm:$0xff] }
  0x5a   :  { %2065 = vmatprep.subr.bf16.mxu0 %v2064_v61 }
  0x5c   :  { %1620 = vmatmul.mubr.f32.gmra.mrb[2].mxu1 %v82_v27  ;;  %v2544_v27 = vld [vmem:[#allocation6 + $0x30] sm:$0xff] }
  0x5d   :  { %1622 = vmatprep.mubr.f32.mxu1 %v83_v28  ;;  %2067 = vmatpush3.bf16.msra.mxu0 %v2064_v61  ;;  %v2548_v28 = vld [vmem:[#allocation6 + $0x38] sm:$0xff] }
  0x60   :  { %1623 = vmatmul.mubr.f32.gmra.mrb[4].mxu1 %v84_v29  ;;  %v2550_v29 = vld [vmem:[#allocation6 + $0x40] sm:$0xff] }
  0x61   :  { %1625 = vmatprep.mubr.f32.mxu1 %v85_v30  ;;  %v2554_v30 = vld [vmem:[#allocation6 + $0x48] sm:$0xff] }
  0x64   :  { %1626 = vmatmul.mubr.f32.gmra.mrb[6].mxu1 %v86_v31  ;;  %v2556_v31 = vld [vmem:[#allocation6 + $0x50] sm:$0xff] }
  0x65   :  { %1628 = vmatprep.mubr.f32.mxu1 %v87_v32  ;;  %v2560_v32 = vld [vmem:[#allocation6 + $0x58] sm:$0xff] }
  0x68   :  { %1629 = vmatmul.mubr.f32.gmra.mrb[8].mxu1 %v88_v33  ;;  %v2562_v33 = vld [vmem:[#allocation6 + $0x60] sm:$0xff] }
  0x69   :  { %1631 = vmatprep.mubr.f32.mxu1 %v89_v34  ;;  %v2566_v34 = vld [vmem:[#allocation6 + $0x68] sm:$0xff] }
  0x6c   :  { %1632 = vmatmul.mubr.f32.gmra.mrb[10].mxu1 %v90_v35  ;;  %v2568_v35 = vld [vmem:[#allocation6 + $0x70] sm:$0xff] }
  0x6d   :  { %1634 = vmatprep.mubr.f32.mxu1 %v91_v36  ;;  %v2572_v36 = vld [vmem:[#allocation6 + $0x78] sm:$0xff] }
  0x70   :  { %1635 = vmatmul.mubr.f32.gmra.mrb[12].mxu1 %v92_v37  ;;  %v431_v37 = vld [vmem:[#allocation2 + $0x70] sm:$0xff] }
  0x71   :  { %1637 = vmatprep.mubr.f32.mxu1 %v93_v38  ;;  %v432_v38 = vld [vmem:[#allocation2 + $0x78] sm:$0xff] }
  0x74   :  { %1638 = vmatmul.mubr.f32.gmra.mrb[14].mxu1 %v94_v39  ;;  %v2068_v39 = vpack.c.bf16 %v432_v38, %v431_v37  ;;  %v748_v37 = vld [vmem:[#allocation4 + $0x48] sm:$0xff] }
  0x75   :  { %1672 = vmatprep.mubr.f32.mxu1 %v2527_v40 }
  0x76   :  { %2069 = vmatprep.subr.bf16.mxu0 %v2068_v39 }
  0x77   :  { %2071 = vmatpush3.bf16.msra.mxu0 %v2068_v39  ;;  %v749_v39 = vld [vmem:[#allocation4 + $0x50] sm:$0xff] }
 0x12b   :  { %v1618_v62 = vpop.f32.mrb[0].mxu1 }
 0x12c   :  { %v177_v63 = vpop.f32.mrb[1].mxu1 }
 0x12d   :  { %v2008_v0 = vpack.c.bf16 %v1618_v62, %v177_v63 }
 0x12f   :  { %v1621_v1 = vpop.f32.mrb[2].mxu1  ;;  %2009 = vmatprep.subr.bf16.mxu1 %v2008_v0 }
 0x130   :  { %v187_v2 = vpop.f32.mrb[3].mxu1  ;;  %2011 = vmatpush3.bf16.msra.mxu1 %v2008_v0 }
 0x131   :  { %v2012_v3 = vpack.c.bf16 %v1621_v1, %v187_v2 }
 0x133   :  { %v1624_v4 = vpop.f32.mrb[4].mxu1  ;;  %2013 = vmatprep.subr.bf16.mxu1 %v2012_v3 }
 0x134   :  { %v197_v5 = vpop.f32.mrb[5].mxu1  ;;  %2015 = vmatpush3.bf16.msra.mxu1 %v2012_v3 }
 0x135   :  { %v2016_v6 = vpack.c.bf16 %v1624_v4, %v197_v5 }
 0x137   :  { %v1627_v7 = vpop.f32.mrb[6].mxu1  ;;  %2017 = vmatprep.subr.bf16.mxu1 %v2016_v6 }
 0x138   :  { %v207_v8 = vpop.f32.mrb[7].mxu1  ;;  %2019 = vmatpush3.bf16.msra.mxu1 %v2016_v6 }
 0x139   :  { %v2020_v9 = vpack.c.bf16 %v1627_v7, %v207_v8 }
 0x13b   :  { %v1630_v10 = vpop.f32.mrb[8].mxu1  ;;  %2021 = vmatprep.subr.bf16.mxu1 %v2020_v9 }
 0x13c   :  { %v217_v11 = vpop.f32.mrb[9].mxu1  ;;  %2023 = vmatpush3.bf16.msra.mxu1 %v2020_v9  ;;  %v739_v9 = vld [vmem:[#allocation4] sm:$0xff] }
 0x13d   :  { %v2024_v12 = vpack.c.bf16 %v1630_v10, %v217_v11  ;;  %v740_v10 = vld [vmem:[#allocation4 + $0x8] sm:$0xff]  ;;  %v741_v11 = vld [vmem:[#allocation4 + $0x10] sm:$0xff] }
 0x13f   :  { %v1633_v13 = vpop.f32.mrb[10].mxu1  ;;  %2025 = vmatprep.subr.bf16.mxu1 %v2024_v12 }
 0x140   :  { %v227_v14 = vpop.f32.mrb[11].mxu1  ;;  %2027 = vmatpush3.bf16.msra.mxu1 %v2024_v12  ;;  %v2104_v12 = vpack.c.bf16 %v740_v10, %v739_v9 }
 0x141   :  { %v2028_v15 = vpack.c.bf16 %v1633_v13, %v227_v14  ;;  %v742_v13 = vld [vmem:[#allocation4 + $0x18] sm:$0xff] }
 0x142   :  { %v2108_v14 = vpack.c.bf16 %v742_v13, %v741_v11  ;;  %2105 = vmatprep.subr.bf16.mxu0 %v2104_v12 }
 0x143   :  { %v1636_v16 = vpop.f32.mrb[12].mxu1  ;;  %2029 = vmatprep.subr.bf16.mxu1 %v2028_v15 }
 0x144   :  { %v237_v17 = vpop.f32.mrb[13].mxu1  ;;  %2031 = vmatpush3.bf16.msra.mxu1 %v2028_v15  ;;  %v743_v15 = vld [vmem:[#allocation4 + $0x20] sm:$0xff] }
 0x145   :  { %v2032_v18 = vpack.c.bf16 %v1636_v16, %v237_v17  ;;  %v744_v16 = vld [vmem:[#allocation4 + $0x28] sm:$0xff] }
 0x146   :  { %v2112_v17 = vpack.c.bf16 %v744_v16, %v743_v15 }
 0x147   :  { %v1639_v19 = vpop.f32.mrb[14].mxu1  ;;  %2033 = vmatprep.subr.bf16.mxu1 %v2032_v18 }
 0x148   :  { %v247_v20 = vpop.f32.mrb[15].mxu1  ;;  %2035 = vmatpush3.bf16.msra.mxu1 %v2032_v18  ;;  %v745_v18 = vld [vmem:[#allocation4 + $0x30] sm:$0xff] }
 0x149   :  { %v2036_v21 = vpack.c.bf16 %v1639_v19, %v247_v20  ;;  %v746_v19 = vld [vmem:[#allocation4 + $0x38] sm:$0xff] }
 0x14a   :  { %v2116_v20 = vpack.c.bf16 %v746_v19, %v745_v18 }
 0x14b   :  { %2037 = vmatprep.subr.bf16.mxu1 %v2036_v21 }
 0x14c   :  { %2039 = vmatpush3.bf16.msra.mxu1 %v2036_v21  ;;  %v747_v21 = vld [vmem:[#allocation4 + $0x40] sm:$0xff] }
 0x14d   :  { %v2120_v38 = vpack.c.bf16 %v748_v37, %v747_v21 }
 0x14f   :  { %1673 = vmatmul.mubr.f32.vlgmr.msra.gmra.mrb[16].mxu1 %v2530_v22 }
 0x150   :  { %1675 = vmatprep.mubr.f32.mxu1 %v2532_v23 }
 0x153   :  { %1676 = vmatmul.mubr.f32.gmra.mrb[18].mxu1 %v2536_v24 }
 0x154   :  { %1678 = vmatprep.mubr.f32.mxu1 %v2538_v25 }
 0x157   :  { %1679 = vmatmul.mubr.f32.gmra.mrb[20].mxu1 %v2542_v26 }
 0x158   :  { %1681 = vmatprep.mubr.f32.mxu1 %v2544_v27 }
 0x15b   :  { %1682 = vmatmul.mubr.f32.gmra.mrb[22].mxu1 %v2548_v28 }
 0x15c   :  { %1684 = vmatprep.mubr.f32.mxu1 %v2550_v29 }
 0x15f   :  { %1685 = vmatmul.mubr.f32.gmra.mrb[24].mxu1 %v2554_v30 }
 0x160   :  { %1687 = vmatprep.mubr.f32.mxu1 %v2556_v31 }
 0x163   :  { %1688 = vmatmul.mubr.f32.gmra.mrb[26].mxu1 %v2560_v32 }
 0x164   :  { %1690 = vmatprep.mubr.f32.mxu1 %v2562_v33 }
 0x167   :  { %1691 = vmatmul.mubr.f32.gmra.mrb[28].mxu1 %v2566_v34 }
 0x168   :  { %1693 = vmatprep.mubr.f32.mxu1 %v2568_v35 }
 0x16b   :  { %1694 = vmatmul.mubr.f32.gmra.mrb[30].mxu1 %v2572_v36 }
 0x16c   :  { %1784 = vmatprep.mubr.f32.mxu1 %v2527_v40 }
 0x222   :  { %v1674_v41 = vpop.f32.mrb[16].mxu1 }
 0x223   :  { %v322_v42 = vpop.f32.mrb[17].mxu1  ;;  %v402_v44 = vmax.f32 %v1674_v41, 0.0  ;;  %v750_v41 = vld [vmem:[#allocation4 + $0x58] sm:$0xff] }
 0x224   :  { %v401_v43 = vmax.f32 %v322_v42, 0.0  ;;  %v2124_v42 = vpack.c.bf16 %v750_v41, %v749_v39 }
 0x226   :  { %v1677_v45 = vpop.f32.mrb[18].mxu1  ;;  %1728 = vmatprep.mubr.f32.mxu0 %v401_v43  ;;  %v751_v43 = vld [vmem:[#allocation4 + $0x60] sm:$0xff] }
 0x227   :  { %v332_v46 = vpop.f32.mrb[19].mxu1  ;;  %1729 = vmatmul.mubr.f32.vlgmr.msra.gmra.mrb[0].mxu0 %v402_v44  ;;  %v404_v48 = vmax.f32 %v1677_v45, 0.0  ;;  %v752_v44 = vld [vmem:[#allocation4 + $0x68] sm:$0xff] }
 0x228   :  { %v403_v47 = vmax.f32 %v332_v46, 0.0  ;;  %2107 = vmatpush3.bf16.msra.mxu0 %v2104_v12  ;;  %v2128_v45 = vpack.c.bf16 %v752_v44, %v751_v43 }
 0x229   :  { %2109 = vmatprep.subr.bf16.mxu0 %v2108_v14 }
 0x22a   :  { %v1680_v49 = vpop.f32.mrb[20].mxu1  ;;  %1731 = vmatprep.mubr.f32.mxu0 %v403_v47 }
 0x22b   :  { %v342_v50 = vpop.f32.mrb[21].mxu1  ;;  %1732 = vmatmul.mubr.f32.gmra.mrb[2].mxu0 %v404_v48  ;;  %v406_v52 = vmax.f32 %v1680_v49, 0.0 }
 0x22c   :  { %v405_v51 = vmax.f32 %v342_v50, 0.0  ;;  %2111 = vmatpush3.bf16.msra.mxu0 %v2108_v14 }
 0x22d   :  { %2113 = vmatprep.subr.bf16.mxu0 %v2112_v17 }
 0x22e   :  { %v1683_v53 = vpop.f32.mrb[22].mxu1  ;;  %1734 = vmatprep.mubr.f32.mxu0 %v405_v51 }
 0x22f   :  { %v352_v54 = vpop.f32.mrb[23].mxu1  ;;  %1735 = vmatmul.mubr.f32.gmra.mrb[4].mxu0 %v406_v52  ;;  %v408_v56 = vmax.f32 %v1683_v53, 0.0 }
 0x230   :  { %v407_v55 = vmax.f32 %v352_v54, 0.0  ;;  %2115 = vmatpush3.bf16.msra.mxu0 %v2112_v17 }
 0x231   :  { %2117 = vmatprep.subr.bf16.mxu0 %v2116_v20 }
 0x232   :  { %v1686_v57 = vpop.f32.mrb[24].mxu1  ;;  %1737 = vmatprep.mubr.f32.mxu0 %v407_v55 }
 0x233   :  { %v362_v58 = vpop.f32.mrb[25].mxu1  ;;  %1738 = vmatmul.mubr.f32.gmra.mrb[6].mxu0 %v408_v56  ;;  %v410_v60 = vmax.f32 %v1686_v57, 0.0 }
 0x234   :  { %v409_v59 = vmax.f32 %v362_v58, 0.0  ;;  %2119 = vmatpush3.bf16.msra.mxu0 %v2116_v20 }
 0x235   :  { %2121 = vmatprep.subr.bf16.mxu0 %v2120_v38 }
 0x236   :  { %v1689_v61 = vpop.f32.mrb[26].mxu1  ;;  %1740 = vmatprep.mubr.f32.mxu0 %v409_v59 }
 0x237   :  { %v372_v62 = vpop.f32.mrb[27].mxu1  ;;  %1741 = vmatmul.mubr.f32.gmra.mrb[8].mxu0 %v410_v60  ;;  %v412_v0 = vmax.f32 %v1689_v61, 0.0 }
 0x238   :  { %v411_v63 = vmax.f32 %v372_v62, 0.0  ;;  %2123 = vmatpush3.bf16.msra.mxu0 %v2120_v38 }
 0x239   :  { %2125 = vmatprep.subr.bf16.mxu0 %v2124_v42 }
 0x23a   :  { %v1692_v1 = vpop.f32.mrb[28].mxu1  ;;  %1743 = vmatprep.mubr.f32.mxu0 %v411_v63 }
 0x23b   :  { %v382_v2 = vpop.f32.mrb[29].mxu1  ;;  %1744 = vmatmul.mubr.f32.gmra.mrb[10].mxu0 %v412_v0  ;;  %v414_v4 = vmax.f32 %v1692_v1, 0.0 }
 0x23c   :  { %v413_v3 = vmax.f32 %v382_v2, 0.0  ;;  %2127 = vmatpush3.bf16.msra.mxu0 %v2124_v42 }
 0x23d   :  { %2129 = vmatprep.subr.bf16.mxu0 %v2128_v45 }
 0x23e   :  { %v1695_v5 = vpop.f32.mrb[30].mxu1  ;;  %1746 = vmatprep.mubr.f32.mxu0 %v413_v3 }
 0x23f   :  { %v392_v6 = vpop.f32.mrb[31].mxu1  ;;  %1747 = vmatmul.mubr.f32.gmra.mrb[12].mxu0 %v414_v4  ;;  %v416_v8 = vmax.f32 %v1695_v5, 0.0 }
 0x240   :  { %v415_v7 = vmax.f32 %v392_v6, 0.0  ;;  %2131 = vmatpush3.bf16.msra.mxu0 %v2128_v45  ;;  %v753_v6 = vld [vmem:[#allocation4 + $0x70] sm:$0xff] }
 0x242   :  { %1749 = vmatprep.mubr.f32.mxu0 %v415_v7  ;;  %v754_v7 = vld [vmem:[#allocation4 + $0x78] sm:$0xff] }
 0x243   :  { %1750 = vmatmul.mubr.f32.gmra.mrb[14].mxu0 %v416_v8  ;;  %v2132_v8 = vpack.c.bf16 %v754_v7, %v753_v6 }
 0x245   :  { %2133 = vmatprep.subr.bf16.mxu0 %v2132_v8 }
 0x246   :  { %2135 = vmatpush3.bf16.msra.mxu0 %v2132_v8 }
 0x2fa   :  { %v1730_v46 = vpop.f32.mrb[0].mxu0 }
 0x2fb   :  { %v499_v47 = vpop.f32.mrb[1].mxu0 }
 0x2fc   :  { %v2072_v48 = vpack.c.bf16 %v1730_v46, %v499_v47 }
 0x2fe   :  { %v1733_v49 = vpop.f32.mrb[2].mxu0  ;;  %2073 = vmatprep.subr.bf16.mxu1 %v2072_v48 }
 0x2ff   :  { %v509_v50 = vpop.f32.mrb[3].mxu0  ;;  %2075 = vmatpush3.bf16.msra.mxu1 %v2072_v48 }
 0x300   :  { %v2076_v51 = vpack.c.bf16 %v1733_v49, %v509_v50 }
 0x302   :  { %v1736_v52 = vpop.f32.mrb[4].mxu0  ;;  %2077 = vmatprep.subr.bf16.mxu1 %v2076_v51 }
 0x303   :  { %v519_v53 = vpop.f32.mrb[5].mxu0  ;;  %2079 = vmatpush3.bf16.msra.mxu1 %v2076_v51 }
 0x304   :  { %v2080_v54 = vpack.c.bf16 %v1736_v52, %v519_v53 }
 0x306   :  { %v1739_v55 = vpop.f32.mrb[6].mxu0  ;;  %2081 = vmatprep.subr.bf16.mxu1 %v2080_v54 }
 0x307   :  { %v529_v56 = vpop.f32.mrb[7].mxu0  ;;  %2083 = vmatpush3.bf16.msra.mxu1 %v2080_v54 }
 0x308   :  { %v2084_v57 = vpack.c.bf16 %v1739_v55, %v529_v56 }
 0x30a   :  { %v1742_v58 = vpop.f32.mrb[8].mxu0  ;;  %2085 = vmatprep.subr.bf16.mxu1 %v2084_v57 }
 0x30b   :  { %v539_v59 = vpop.f32.mrb[9].mxu0  ;;  %2087 = vmatpush3.bf16.msra.mxu1 %v2084_v57 }
 0x30c   :  { %v2088_v60 = vpack.c.bf16 %v1742_v58, %v539_v59 }
 0x30e   :  { %v1745_v61 = vpop.f32.mrb[10].mxu0  ;;  %2089 = vmatprep.subr.bf16.mxu1 %v2088_v60 }
 0x30f   :  { %v549_v62 = vpop.f32.mrb[11].mxu0  ;;  %2091 = vmatpush3.bf16.msra.mxu1 %v2088_v60 }
 0x310   :  { %v2092_v63 = vpack.c.bf16 %v1745_v61, %v549_v62 }
 0x312   :  { %v1748_v0 = vpop.f32.mrb[12].mxu0  ;;  %2093 = vmatprep.subr.bf16.mxu1 %v2092_v63 }
 0x313   :  { %v559_v1 = vpop.f32.mrb[13].mxu0  ;;  %2095 = vmatpush3.bf16.msra.mxu1 %v2092_v63 }
 0x314   :  { %v2096_v2 = vpack.c.bf16 %v1748_v0, %v559_v1 }
 0x316   :  { %v1751_v3 = vpop.f32.mrb[14].mxu0  ;;  %2097 = vmatprep.subr.bf16.mxu1 %v2096_v2 }
 0x317   :  { %v569_v4 = vpop.f32.mrb[15].mxu0  ;;  %2099 = vmatpush3.bf16.msra.mxu1 %v2096_v2 }
 0x318   :  { %v2100_v5 = vpack.c.bf16 %v1751_v3, %v569_v4 }
 0x31a   :  { %2101 = vmatprep.subr.bf16.mxu1 %v2100_v5 }
 0x31b   :  { %2103 = vmatpush3.bf16.msra.mxu1 %v2100_v5 }
 0x31e   :  { %1785 = vmatmul.mubr.f32.vlgmr.msra.gmra.mrb[32].mxu1 %v2530_v22 }
 0x31f   :  { %1787 = vmatprep.mubr.f32.mxu1 %v2532_v23 }
 0x322   :  { %1788 = vmatmul.mubr.f32.gmra.mrb[34].mxu1 %v2536_v24 }
 0x323   :  { %1790 = vmatprep.mubr.f32.mxu1 %v2538_v25 }
 0x326   :  { %1791 = vmatmul.mubr.f32.gmra.mrb[36].mxu1 %v2542_v26 }
 0x327   :  { %1793 = vmatprep.mubr.f32.mxu1 %v2544_v27 }
 0x32a   :  { %1794 = vmatmul.mubr.f32.gmra.mrb[38].mxu1 %v2548_v28 }
 0x32b   :  { %1796 = vmatprep.mubr.f32.mxu1 %v2550_v29 }
 0x32e   :  { %1797 = vmatmul.mubr.f32.gmra.mrb[40].mxu1 %v2554_v30 }
 0x32f   :  { %1799 = vmatprep.mubr.f32.mxu1 %v2556_v31 }
 0x332   :  { %1800 = vmatmul.mubr.f32.gmra.mrb[42].mxu1 %v2560_v32 }
 0x333   :  { %1802 = vmatprep.mubr.f32.mxu1 %v2562_v33 }
 0x336   :  { %1803 = vmatmul.mubr.f32.gmra.mrb[44].mxu1 %v2566_v34 }
 0x337   :  { %1805 = vmatprep.mubr.f32.mxu1 %v2568_v35 }
 0x33a   :  { %1806 = vmatmul.mubr.f32.gmra.mrb[46].mxu1 %v2572_v36 }
 0x33b   :  { %1896 = vmatprep.mubr.f32.mxu1 %v2527_v40 }
 0x3f1   :  { %v1786_v9 = vpop.f32.mrb[32].mxu1 }
 0x3f2   :  { %v644_v10 = vpop.f32.mrb[33].mxu1  ;;  %v724_v12 = vmax.f32 %v1786_v9, 0.0 }
 0x3f3   :  { %v723_v11 = vmax.f32 %v644_v10, 0.0 }
 0x3f5   :  { %v1789_v13 = vpop.f32.mrb[34].mxu1  ;;  %1840 = vmatprep.mubr.f32.mxu0 %v723_v11 }
 0x3f6   :  { %v654_v14 = vpop.f32.mrb[35].mxu1  ;;  %1841 = vmatmul.mubr.f32.vlgmr.msra.gmra.mrb[16].mxu0 %v724_v12  ;;  %v726_v16 = vmax.f32 %v1789_v13, 0.0 }
 0x3f7   :  { %v725_v15 = vmax.f32 %v654_v14, 0.0 }
 0x3f9   :  { %v1792_v17 = vpop.f32.mrb[36].mxu1  ;;  %1843 = vmatprep.mubr.f32.mxu0 %v725_v15 }
 0x3fa   :  { %v664_v18 = vpop.f32.mrb[37].mxu1  ;;  %1844 = vmatmul.mubr.f32.gmra.mrb[18].mxu0 %v726_v16  ;;  %v728_v19 = vmax.f32 %v1792_v17, 0.0 }
 0x3fb   :  { %v727_v40 = vmax.f32 %v664_v18, 0.0 }
 0x3fd   :  { %v1795_v20 = vpop.f32.mrb[38].mxu1  ;;  %1846 = vmatprep.mubr.f32.mxu0 %v727_v40 }
 0x3fe   :  { %v674_v21 = vpop.f32.mrb[39].mxu1  ;;  %1847 = vmatmul.mubr.f32.gmra.mrb[20].mxu0 %v728_v19  ;;  %v730_v38 = vmax.f32 %v1795_v20, 0.0 }
 0x3ff   :  { %v729_v37 = vmax.f32 %v674_v21, 0.0 }
 0x401   :  { %v1798_v39 = vpop.f32.mrb[40].mxu1  ;;  %1849 = vmatprep.mubr.f32.mxu0 %v729_v37 }
 0x402   :  { %v684_v41 = vpop.f32.mrb[41].mxu1  ;;  %1850 = vmatmul.mubr.f32.gmra.mrb[22].mxu0 %v730_v38  ;;  %v732_v43 = vmax.f32 %v1798_v39, 0.0 }
 0x403   :  { %v731_v42 = vmax.f32 %v684_v41, 0.0 }
 0x405   :  { %v1801_v44 = vpop.f32.mrb[42].mxu1  ;;  %1852 = vmatprep.mubr.f32.mxu0 %v731_v42 }
 0x406   :  { %v694_v45 = vpop.f32.mrb[43].mxu1  ;;  %1853 = vmatmul.mubr.f32.gmra.mrb[24].mxu0 %v732_v43  ;;  %v734_v47 = vmax.f32 %v1801_v44, 0.0 }
 0x407   :  { %v733_v46 = vmax.f32 %v694_v45, 0.0 }
 0x409   :  { %v1804_v48 = vpop.f32.mrb[44].mxu1  ;;  %1855 = vmatprep.mubr.f32.mxu0 %v733_v46 }
 0x40a   :  { %v704_v49 = vpop.f32.mrb[45].mxu1  ;;  %1856 = vmatmul.mubr.f32.gmra.mrb[26].mxu0 %v734_v47  ;;  %v736_v51 = vmax.f32 %v1804_v48, 0.0 }
 0x40b   :  { %v735_v50 = vmax.f32 %v704_v49, 0.0 }
 0x40d   :  { %v1807_v52 = vpop.f32.mrb[46].mxu1  ;;  %1858 = vmatprep.mubr.f32.mxu0 %v735_v50 }
 0x40e   :  { %v714_v53 = vpop.f32.mrb[47].mxu1  ;;  %1859 = vmatmul.mubr.f32.gmra.mrb[28].mxu0 %v736_v51  ;;  %v738_v55 = vmax.f32 %v1807_v52, 0.0 }
 0x40f   :  { %v737_v54 = vmax.f32 %v714_v53, 0.0 }
 0x411   :  { %1861 = vmatprep.mubr.f32.mxu0 %v737_v54 }
 0x412   :  { %1862 = vmatmul.mubr.f32.gmra.mrb[30].mxu0 %v738_v55 }
 0x4c9   :  { %v1842_v56 = vpop.f32.mrb[16].mxu0 }
 0x4ca   :  { %v821_v57 = vpop.f32.mrb[17].mxu0 }
 0x4cb   :  { %v2136_v58 = vpack.c.bf16 %v1842_v56, %v821_v57 }
 0x4cd   :  { %v1845_v59 = vpop.f32.mrb[18].mxu0  ;;  %2137 = vmatprep.subr.bf16.mxu1 %v2136_v58 }
 0x4ce   :  { %v831_v60 = vpop.f32.mrb[19].mxu0  ;;  %2139 = vmatpush3.bf16.msra.mxu1 %v2136_v58 }
 0x4cf   :  { %v2140_v61 = vpack.c.bf16 %v1845_v59, %v831_v60 }
 0x4d1   :  { %v1848_v62 = vpop.f32.mrb[20].mxu0  ;;  %2141 = vmatprep.subr.bf16.mxu1 %v2140_v61 }
 0x4d2   :  { %v841_v63 = vpop.f32.mrb[21].mxu0  ;;  %2143 = vmatpush3.bf16.msra.mxu1 %v2140_v61 }
 0x4d3   :  { %v2144_v0 = vpack.c.bf16 %v1848_v62, %v841_v63 }
 0x4d5   :  { %v1851_v1 = vpop.f32.mrb[22].mxu0  ;;  %2145 = vmatprep.subr.bf16.mxu1 %v2144_v0 }
 0x4d6   :  { %v851_v2 = vpop.f32.mrb[23].mxu0  ;;  %2147 = vmatpush3.bf16.msra.mxu1 %v2144_v0 }
 0x4d7   :  { %v2148_v3 = vpack.c.bf16 %v1851_v1, %v851_v2 }
 0x4d9   :  { %v1854_v4 = vpop.f32.mrb[24].mxu0  ;;  %2149 = vmatprep.subr.bf16.mxu1 %v2148_v3 }
 0x4da   :  { %v861_v5 = vpop.f32.mrb[25].mxu0  ;;  %2151 = vmatpush3.bf16.msra.mxu1 %v2148_v3 }
 0x4db   :  { %v2152_v6 = vpack.c.bf16 %v1854_v4, %v861_v5 }
 0x4dd   :  { %v1857_v7 = vpop.f32.mrb[26].mxu0  ;;  %2153 = vmatprep.subr.bf16.mxu1 %v2152_v6 }
 0x4de   :  { %v871_v8 = vpop.f32.mrb[27].mxu0  ;;  %2155 = vmatpush3.bf16.msra.mxu1 %v2152_v6 }
 0x4df   :  { %v2156_v9 = vpack.c.bf16 %v1857_v7, %v871_v8 }
 0x4e1   :  { %v1860_v10 = vpop.f32.mrb[28].mxu0  ;;  %2157 = vmatprep.subr.bf16.mxu1 %v2156_v9 }
 0x4e2   :  { %v881_v11 = vpop.f32.mrb[29].mxu0  ;;  %2159 = vmatpush3.bf16.msra.mxu1 %v2156_v9 }
 0x4e3   :  { %v2160_v12 = vpack.c.bf16 %v1860_v10, %v881_v11 }
 0x4e5   :  { %v1863_v13 = vpop.f32.mrb[30].mxu0  ;;  %2161 = vmatprep.subr.bf16.mxu1 %v2160_v12 }
 0x4e6   :  { %v891_v14 = vpop.f32.mrb[31].mxu0  ;;  %2163 = vmatpush3.bf16.msra.mxu1 %v2160_v12 }
 0x4e7   :  { %v2164_v15 = vpack.c.bf16 %v1863_v13, %v891_v14 }
 0x4e9   :  { %2165 = vmatprep.subr.bf16.mxu1 %v2164_v15 }
 0x4ea   :  { %2167 = vmatpush3.bf16.msra.mxu1 %v2164_v15 }
 0x4ed   :  { %1897 = vmatmul.mubr.f32.vlgmr.msra.gmra.mrb[48].mxu1 %v2530_v22 }
 0x4ee   :  { %1899 = vmatprep.mubr.f32.mxu1 %v2532_v23 }
 0x4f1   :  { %1900 = vmatmul.mubr.f32.gmra.mrb[50].mxu1 %v2536_v24 }
 0x4f2   :  { %1902 = vmatprep.mubr.f32.mxu1 %v2538_v25 }
 0x4f5   :  { %1903 = vmatmul.mubr.f32.gmra.mrb[52].mxu1 %v2542_v26 }
 0x4f6   :  { %1905 = vmatprep.mubr.f32.mxu1 %v2544_v27 }
 0x4f9   :  { %1906 = vmatmul.mubr.f32.gmra.mrb[54].mxu1 %v2548_v28 }
 0x4fa   :  { %1908 = vmatprep.mubr.f32.mxu1 %v2550_v29 }
 0x4fd   :  { %1909 = vmatmul.mubr.f32.gmra.mrb[56].mxu1 %v2554_v30 }
 0x4fe   :  { %1911 = vmatprep.mubr.f32.mxu1 %v2556_v31 }
 0x501   :  { %1912 = vmatmul.mubr.f32.gmra.mrb[58].mxu1 %v2560_v32 }
 0x502   :  { %1914 = vmatprep.mubr.f32.mxu1 %v2562_v33 }
 0x505   :  { %1915 = vmatmul.mubr.f32.gmra.mrb[60].mxu1 %v2566_v34 }
 0x506   :  { %1917 = vmatprep.mubr.f32.mxu1 %v2568_v35 }
 0x509   :  { %1918 = vmatmul.mubr.f32.gmra.mrb[62].mxu1 %v2572_v36 }
 0x5c0   :  { %v1898_v22 = vpop.f32.mrb[48].mxu1 }
 0x5c1   :  { %v2607_v23 = vmax.f32 %v1898_v22, 0.0  ;;  %v966_v24 = vpop.f32.mrb[49].mxu1 }
 0x5c2   :  { %v1045_v25 = vmax.f32 %v966_v24, 0.0 }
 0x5c3   :  { %1062 = vst [vmem:[%s2718_s5 + $0x8] sm:$0xff] %v2607_v23 }
 0x5c4   :  { %1061 = vst [vmem:[%s2718_s5] sm:$0xff] %v1045_v25  ;;  %1952 = vmatprep.mubr.f32.mxu0 %v1045_v25  ;;  %v2168_v26 = vpack.c.bf16 %v2607_v23, %v1045_v25  ;;  %v1901_v27 = vpop.f32.mrb[50].mxu1 }
 0x5c5   :  { %v2617_v28 = vmax.f32 %v1901_v27, 0.0  ;;  %v976_v29 = vpop.f32.mrb[51].mxu1 }
 0x5c6   :  { %2169 = vmatprep.subr.bf16.mxu0 %v2168_v26  ;;  %v1047_v30 = vmax.f32 %v976_v29, 0.0 }
 0x5c7   :  { %2171 = vmatpush3.bf16.xpose.msra.mxu0 %v2168_v26  ;;  %1064 = vst [vmem:[%s2718_s5 + $0x18] sm:$0xff] %v2617_v28 }
 0x5c8   :  { %1063 = vst [vmem:[%s2718_s5 + $0x10] sm:$0xff] %v1047_v30  ;;  %v2172_v31 = vpack.c.bf16 %v2617_v28, %v1047_v30  ;;  %v1904_v32 = vpop.f32.mrb[52].mxu1 }
 0x5c9   :  { %v1050_v33 = vmax.f32 %v1904_v32, 0.0  ;;  %v986_v34 = vpop.f32.mrb[53].mxu1 }
 0x5ca   :  { %2173 = vmatprep.subr.bf16.mxu0 %v2172_v31  ;;  %v1049_v35 = vmax.f32 %v986_v34, 0.0 }
 0x5cb   :  { %1066 = vst [vmem:[%s2718_s5 + $0x28] sm:$0xff] %v1050_v33 }
 0x5cc   :  { %1065 = vst [vmem:[%s2718_s5 + $0x20] sm:$0xff] %v1049_v35  ;;  %v2176_v36 = vpack.c.bf16 %v1050_v33, %v1049_v35  ;;  %v1907_v16 = vpop.f32.mrb[54].mxu1 }
 0x5cd   :  { %v1052_v17 = vmax.f32 %v1907_v16, 0.0  ;;  %v996_v18 = vpop.f32.mrb[55].mxu1 }
 0x5ce   :  { %v1051_v40 = vmax.f32 %v996_v18, 0.0 }
 0x5cf   :  { %2175 = vmatpush3.bf16.xpose.msra.mxu0 %v2172_v31  ;;  %1068 = vst [vmem:[%s2718_s5 + $0x38] sm:$0xff] %v1052_v17 }
 0x5d0   :  { %2177 = vmatprep.subr.bf16.mxu0 %v2176_v36  ;;  %1067 = vst [vmem:[%s2718_s5 + $0x30] sm:$0xff] %v1051_v40  ;;  %v1910_v19 = vpop.f32.mrb[56].mxu1  ;;  %v2180_v38 = vpack.c.bf16 %v1052_v17, %v1051_v40 }
 0x5d1   :  { %v1054_v20 = vmax.f32 %v1910_v19, 0.0  ;;  %v1006_v21 = vpop.f32.mrb[57].mxu1 }
 0x5d2   :  { %v1053_v37 = vmax.f32 %v1006_v21, 0.0 }
 0x5d3   :  { %1070 = vst [vmem:[%s2718_s5 + $0x48] sm:$0xff] %v1054_v20 }
 0x5d4   :  { %1069 = vst [vmem:[%s2718_s5 + $0x40] sm:$0xff] %v1053_v37  ;;  %v1913_v39 = vpop.f32.mrb[58].mxu1  ;;  %v2184_v48 = vpack.c.bf16 %v1054_v20, %v1053_v37 }
 0x5d5   :  { %v1056_v41 = vmax.f32 %v1913_v39, 0.0  ;;  %v1016_v42 = vpop.f32.mrb[59].mxu1 }
 0x5d6   :  { %v1055_v43 = vmax.f32 %v1016_v42, 0.0 }
 0x5d7   :  { %2179 = vmatpush3.bf16.xpose.msra.mxu0 %v2176_v36  ;;  %1072 = vst [vmem:[%s2718_s5 + $0x58] sm:$0xff] %v1056_v41 }
 0x5d8   :  { %2181 = vmatprep.subr.bf16.mxu0 %v2180_v38  ;;  %1071 = vst [vmem:[%s2718_s5 + $0x50] sm:$0xff] %v1055_v43  ;;  %v1916_v44 = vpop.f32.mrb[60].mxu1  ;;  %v2188_v53 = vpack.c.bf16 %v1056_v41, %v1055_v43 }
 0x5d9   :  { %v1058_v45 = vmax.f32 %v1916_v44, 0.0  ;;  %v1026_v46 = vpop.f32.mrb[61].mxu1 }
 0x5da   :  { %v1057_v47 = vmax.f32 %v1026_v46, 0.0 }
 0x5db   :  { %1074 = vst [vmem:[%s2718_s5 + $0x68] sm:$0xff] %v1058_v45 }
 0x5dc   :  { %1073 = vst [vmem:[%s2718_s5 + $0x60] sm:$0xff] %v1057_v47  ;;  %v1919_v49 = vpop.f32.mrb[62].mxu1  ;;  %v2192_v54 = vpack.c.bf16 %v1058_v45, %v1057_v47 }
 0x5dd   :  { %v1060_v50 = vmax.f32 %v1919_v49, 0.0  ;;  %v1036_v51 = vpop.f32.mrb[63].mxu1 }
 0x5de   :  { %v1059_v52 = vmax.f32 %v1036_v51, 0.0 }
 0x5df   :  { %2183 = vmatpush3.bf16.xpose.msra.mxu0 %v2180_v38  ;;  %1076 = vst [vmem:[%s2718_s5 + $0x78] sm:$0xff] %v1060_v50 }
 0x5e0   :  { %2185 = vmatprep.subr.bf16.mxu0 %v2184_v48  ;;  %1075 = vst [vmem:[%s2718_s5 + $0x70] sm:$0xff] %v1059_v52  ;;  %v2196_v55 = vpack.c.bf16 %v1060_v50, %v1059_v52 }
 0x5e7   :  { %2187 = vmatpush3.bf16.xpose.msra.mxu0 %v2184_v48 }
 0x5e8   :  { %2189 = vmatprep.subr.bf16.mxu0 %v2188_v53 }
 0x5ef   :  { %2191 = vmatpush3.bf16.xpose.msra.mxu0 %v2188_v53 }
 0x5f0   :  { %2193 = vmatprep.subr.bf16.mxu0 %v2192_v54 }
 0x5f7   :  { %2195 = vmatpush3.bf16.xpose.msra.mxu0 %v2192_v54 }
 0x5f8   :  { %2197 = vmatprep.subr.bf16.mxu0 %v2196_v55 }
 0x5ff   :  { %2199 = vmatpush3.bf16.xpose.msra.mxu0 %v2196_v55 }
 0x606   :  { %1953 = vmatmul.mubr.f32.vlgmr.msra.gmra.mrb[32].mxu0 %v2607_v23 }
 0x607   :  { %1955 = vmatprep.mubr.f32.mxu0 %v1047_v30 }
 0x60a   :  { %1956 = vmatmul.mubr.f32.gmra.mrb[34].mxu0 %v2617_v28 }
 0x60b   :  { %1958 = vmatprep.mubr.f32.mxu0 %v1049_v35 }
 0x60e   :  { %1959 = vmatmul.mubr.f32.gmra.mrb[36].mxu0 %v1050_v33 }
 0x60f   :  { %1961 = vmatprep.mubr.f32.mxu0 %v1051_v40 }
 0x612   :  { %1962 = vmatmul.mubr.f32.gmra.mrb[38].mxu0 %v1052_v17 }
 0x613   :  { %1964 = vmatprep.mubr.f32.mxu0 %v1053_v37 }
 0x616   :  { %1965 = vmatmul.mubr.f32.gmra.mrb[40].mxu0 %v1054_v20 }
 0x617   :  { %1967 = vmatprep.mubr.f32.mxu0 %v1055_v43 }
 0x61a   :  { %1968 = vmatmul.mubr.f32.gmra.mrb[42].mxu0 %v1056_v41 }
 0x61b   :  { %1970 = vmatprep.mubr.f32.mxu0 %v1057_v47 }
 0x61e   :  { %1971 = vmatmul.mubr.f32.gmra.mrb[44].mxu0 %v1058_v45 }
 0x61f   :  { %1973 = vmatprep.mubr.f32.mxu0 %v1059_v52 }
 0x622   :  { %1974 = vmatmul.mubr.f32.gmra.mrb[46].mxu0 %v1060_v50 }
 0x6d9   :  { %v1954_v56 = vpop.f32.mrb[32].mxu0 }
 0x6da   :  { %v1345_v57 = vmul.f32 -1.442695, %v1954_v56  ;;  %v1143_v58 = vpop.f32.mrb[33].mxu0 }
 0x6db   :  { %v1344_v59 = vmul.f32 -1.442695, %v1143_v58 }
 0x6dc   :  { %2205 = vpow2.f32 %v1345_v57 }
 0x6dd   :  { %2207 = vpow2.f32 %v1344_v59  ;;  %v1957_v60 = vpop.f32.mrb[34].mxu0 }
 0x6de   :  { %v1347_v61 = vmul.f32 -1.442695, %v1957_v60  ;;  %v1153_v62 = vpop.f32.mrb[35].mxu0 }
 0x6df   :  { %v1346_v63 = vmul.f32 -1.442695, %v1153_v62 }
 0x6e0   :  { %2209 = vpow2.f32 %v1347_v61 }
 0x6e1   :  { %2211 = vpow2.f32 %v1346_v63  ;;  %v1960_v0 = vpop.f32.mrb[36].mxu0 }
 0x6e2   :  { %v1349_v1 = vmul.f32 -1.442695, %v1960_v0  ;;  %v1163_v2 = vpop.f32.mrb[37].mxu0 }
 0x6e3   :  { %v1348_v3 = vmul.f32 -1.442695, %v1163_v2 }
 0x6e4   :  { %2213 = vpow2.f32 %v1349_v1 }
 0x6e5   :  { %2215 = vpow2.f32 %v1348_v3  ;;  %v1963_v4 = vpop.f32.mrb[38].mxu0 }
 0x6e6   :  { %v2206_v5 = vpop.eup %2205  ;;  %v1351_v6 = vmul.f32 -1.442695, %v1963_v4  ;;  %v1173_v7 = vpop.f32.mrb[39].mxu0 }
 0x6e7   :  { %v2208_v8 = vpop.eup %2207  ;;  %v1271_v9 = vadd.f32 1.0, %v2206_v5  ;;  %v1350_v10 = vmul.f32 -1.442695, %v1173_v7 }
 0x6e8   :  { %v1270_v11 = vadd.f32 1.0, %v2208_v8  ;;  %2217 = vpow2.f32 %v1351_v6 }
 0x6e9   :  { %2219 = vrcp.f32 %v1271_v9  ;;  %v1966_v12 = vpop.f32.mrb[40].mxu0 }
 0x6ea   :  { %v2210_v13 = vpop.eup %2209  ;;  %2221 = vrcp.f32 %v1270_v11  ;;  %v1353_v14 = vmul.f32 -1.442695, %v1966_v12  ;;  %v1183_v15 = vpop.f32.mrb[41].mxu0 }
 0x6eb   :  { %v2212_v22 = vpop.eup %2211  ;;  %v1273_v23 = vadd.f32 1.0, %v2210_v13  ;;  %2223 = vpow2.f32 %v1350_v10  ;;  %v1352_v24 = vmul.f32 -1.442695, %v1183_v15 }
 0x6ec   :  { %v1272_v25 = vadd.f32 1.0, %v2212_v22  ;;  %2225 = vpow2.f32 %v1353_v14 }
 0x6ed   :  { %2227 = vrcp.f32 %v1273_v23  ;;  %v1969_v26 = vpop.f32.mrb[42].mxu0 }
 0x6ee   :  { %v2214_v27 = vpop.eup %2213  ;;  %2229 = vrcp.f32 %v1272_v25  ;;  %v1355_v28 = vmul.f32 -1.442695, %v1969_v26  ;;  %v1193_v29 = vpop.f32.mrb[43].mxu0 }
 0x6ef   :  { %v2216_v30 = vpop.eup %2215  ;;  %v1275_v31 = vadd.f32 1.0, %v2214_v27  ;;  %2231 = vpow2.f32 %v1352_v24  ;;  %v1354_v32 = vmul.f32 -1.442695, %v1193_v29 }
 0x6f0   :  { %v1274_v33 = vadd.f32 1.0, %v2216_v30  ;;  %2233 = vpow2.f32 %v1355_v28 }
 0x6f1   :  { %2235 = vrcp.f32 %v1275_v31  ;;  %v1972_v34 = vpop.f32.mrb[44].mxu0 }
 0x6f2   :  { %v2218_v35 = vpop.eup %2217  ;;  %2237 = vrcp.f32 %v1274_v33  ;;  %v1357_v36 = vmul.f32 -1.442695, %v1972_v34  ;;  %v1203_v16 = vpop.f32.mrb[45].mxu0 }
 0x6f3   :  { %v2220_v17 = vpop.eup %2219  ;;  %v1277_v18 = vadd.f32 1.0, %v2218_v35  ;;  %2239 = vpow2.f32 %v1354_v32  ;;  %v1356_v40 = vmul.f32 -1.442695, %v1203_v16 }
 0x6f4   :  { %v2222_v19 = vpop.eup %2221  ;;  %1319 = vst [vmem:[%s2719_s6 + $0x8] sm:$0xff] %v2220_v17  ;;  %2241 = vpow2.f32 %v1357_v36 }
 0x6f5   :  { %v2224_v20 = vpop.eup %2223  ;;  %1318 = vst [vmem:[%s2719_s6] sm:$0xff] %v2222_v19  ;;  %2243 = vrcp.f32 %v1277_v18  ;;  %v1975_v21 = vpop.f32.mrb[46].mxu0 }
 0x6f6   :  { %v2226_v37 = vpop.eup %2225  ;;  %v1276_v38 = vadd.f32 1.0, %v2224_v20  ;;  %2245 = vpow2.f32 %v1356_v40  ;;  %v1359_v39 = vmul.f32 -1.442695, %v1975_v21  ;;  %v1213_v41 = vpop.f32.mrb[47].mxu0 }
 0x6f7   :  { %v2228_v42 = vpop.eup %2227  ;;  %v1279_v43 = vadd.f32 1.0, %v2226_v37  ;;  %v1358_v44 = vmul.f32 -1.442695, %v1213_v41 }
 0x6f8   :  { %v2230_v45 = vpop.eup %2229  ;;  %1321 = vst [vmem:[%s2719_s6 + $0x18] sm:$0xff] %v2228_v42  ;;  %2247 = vrcp.f32 %v1276_v38 }
 0x6f9   :  { %v2232_v46 = vpop.eup %2231  ;;  %1320 = vst [vmem:[%s2719_s6 + $0x10] sm:$0xff] %v2230_v45  ;;  %2249 = vrcp.f32 %v1279_v43 }
 0x6fa   :  { %v2234_v47 = vpop.eup %2233  ;;  %v1278_v48 = vadd.f32 1.0, %v2232_v46  ;;  %2251 = vpow2.f32 %v1359_v39 }
 0x6fb   :  { %v2236_v49 = vpop.eup %2235  ;;  %v1281_v50 = vadd.f32 1.0, %v2234_v47  ;;  %2253 = vpow2.f32 %v1358_v44 }
 0x6fc   :  { %v2238_v51 = vpop.eup %2237  ;;  %1323 = vst [vmem:[%s2719_s6 + $0x28] sm:$0xff] %v2236_v49  ;;  %2255 = vrcp.f32 %v1278_v48 }
 0x6fd   :  { %v2240_v52 = vpop.eup %2239  ;;  %1322 = vst [vmem:[%s2719_s6 + $0x20] sm:$0xff] %v2238_v51  ;;  %2257 = vrcp.f32 %v1281_v50 }
 0x6fe   :  { %v2242_v53 = vpop.eup %2241  ;;  %v1280_v54 = vadd.f32 1.0, %v2240_v52 }
 0x6ff   :  { %v2244_v55 = vpop.eup %2243  ;;  %v1283_v56 = vadd.f32 1.0, %v2242_v53 }
 0x700   :  { %v2246_v57 = vpop.eup %2245  ;;  %1325 = vst [vmem:[%s2719_s6 + $0x38] sm:$0xff] %v2244_v55  ;;  %2259 = vrcp.f32 %v1280_v54 }
 0x701   :  { %2261 = vrcp.f32 %v1283_v56  ;;  %v1282_v58 = vadd.f32 1.0, %v2246_v57 }
 0x702   :  { %v2248_v59 = vpop.eup %2247 }
 0x703   :  { %v2250_v60 = vpop.eup %2249  ;;  %1324 = vst [vmem:[%s2719_s6 + $0x30] sm:$0xff] %v2248_v59  ;;  %2263 = vrcp.f32 %v1282_v58 }
 0x704   :  { %v2252_v61 = vpop.eup %2251  ;;  %1327 = vst [vmem:[%s2719_s6 + $0x48] sm:$0xff] %v2250_v60 }
 0x705   :  { %v2254_v62 = vpop.eup %2253  ;;  %v1285_v63 = vadd.f32 1.0, %v2252_v61 }
 0x706   :  { %v2256_v0 = vpop.eup %2255  ;;  %v1284_v1 = vadd.f32 1.0, %v2254_v62 }
 0x707   :  { %v2258_v2 = vpop.eup %2257  ;;  %1326 = vst [vmem:[%s2719_s6 + $0x40] sm:$0xff] %v2256_v0  ;;  %2265 = vrcp.f32 %v1285_v63 }
 0x708   :  { %1329 = vst [vmem:[%s2719_s6 + $0x58] sm:$0xff] %v2258_v2  ;;  %2267 = vrcp.f32 %v1284_v1 }
 0x70a   :  { %v2260_v3 = vpop.eup %2259 }
 0x70b   :  { %v2262_v4 = vpop.eup %2261  ;;  %1328 = vst [vmem:[%s2719_s6 + $0x50] sm:$0xff] %v2260_v3 }
 0x70c   :  { %1331 = vst [vmem:[%s2719_s6 + $0x68] sm:$0xff] %v2262_v4 }
 0x70d   :  { %v2264_v5 = vpop.eup %2263 }
 0x70e   :  { %1330 = vst [vmem:[%s2719_s6 + $0x60] sm:$0xff] %v2264_v5 }
 0x711   :  { %v2266_v6 = vpop.eup %2265 }
 0x712   :  { %v2268_v7 = vpop.eup %2267  ;;  %1333 = vst [vmem:[%s2719_s6 + $0x78] sm:$0xff] %v2266_v6 }
 0x713   :  { %1332 = vst [vmem:[%s2719_s6 + $0x70] sm:$0xff] %v2268_v7 }
 0x714   :  { %1342 = vsyncpa [#allocation3], 1 }
 0x715   :  { %1343 = vsyncpa [#allocation5], 1 }

</bundles_post_ra>
